<compile_context>
chip_gen: v7x
topology: tpu7x:2x2x1
jax: 0.10.0
libtpu: 0.0.40
codegen_flags: <defaults>
</compile_context>

<pallas_src>
import functools

import jax
import jax.numpy as jnp
from jax import lax
from jax.experimental import pallas as pl
from jax.experimental.pallas import tpu as pltpu


def _round_up(x, m):
    return (x + m - 1) // m * m


def _tensorcores_per_chip():
    """1 for v5e/v6e (single TensorCore), 2 for v7x / v4 / v5p style chips."""
    try:
        kind = jax.devices()[0].device_kind.lower().replace(" ", "")
    except Exception:
        return 1
    if any(tag in kind for tag in ("v7", "7x", "v5p", "v4")):
        return 2
    return 1


def _double_convblock_kernel(x_ref, w1_ref, w2_ref, o_ref, *, H, W, K,
                             C_in, C_out, C_in_pad, C_out_pad, block_b,
                             mm_dtype):
    """Processes `block_b` images per grid step, stacked on the lane axis.

    x_ref  : [C_in , block_b*H*W]  raw input (channels on sublanes, images
                                   concatenated along lanes)
    w1_ref : [C_out, K*K*C_in_pad  + 1]          conv1 weight + bias column
    w2_ref : [C_out, K*K*C_out_pad + C_in + 1]   conv2 weight + 1x1 residual
                                                 columns + (b2+b_res) column
    o_ref  : [C_out, block_b*H*W]
    """
    HW = H * W
    L = block_b * HW
    pad = (K - 1) // 2
    taps = [(kh, kw) for kh in range(K) for kw in range(K)]

    # Per-image (row, col) index of every lane position.  Periodic with period
    # H*W, so one mask set serves all block_b images stacked on the lane axis.
    pidx = lax.broadcasted_iota(jnp.int32, (1, L), 1)
    if HW & (HW - 1) == 0:                        # power-of-two: no vector int div
        pos = jnp.bitwise_and(pidx, HW - 1)
    else:
        pos = pidx % HW
    if W & (W - 1) == 0:
        row_idx = jnp.right_shift(pos, int(W).bit_length() - 1)
        col_idx = jnp.bitwise_and(pos, W - 1)
    else:
        row_idx = pos // W
        col_idx = pos - row_idx * W

    masks = {}
    for kh, kw in taps:
        dh, dw = kh - pad, kw - pad
        conds = []
        if dh > 0:
            conds.append(row_idx < H - dh)
        elif dh < 0:
            conds.append(row_idx >= -dh)
        if dw > 0:
            conds.append(col_idx < W - dw)
        elif dw < 0:
            conds.append(col_idx >= -dw)
        m = None
        for c in conds:
            m = c if m is None else jnp.logical_and(m, c)
        masks[(kh, kw)] = m                       # None => center tap, no masking

    def tap_block(v, kh, kw):
        """v: [C_pad, L] f32.  Shift by tap (kh, kw); zero outside each image.

        The masks zero exactly the positions a lane roll would contaminate
        across image (and row) boundaries, so rolling the concatenated lane
        axis is equivalent to per-image zero padding (relu(0) == 0).
        """
        dh, dw = kh - pad, kw - pad
        s = dh * W + dw
        out = v if s == 0 else pltpu.roll(v, shift=(-s) % L, axis=1)
        m = masks[(kh, kw)]
        return out if m is None else jnp.where(m, out, 0.0)

    ones_row = jnp.ones((1, L), jnp.float32)      # bias row (weights carry b1/b2)

    # ---- conv1: one MXU matmul over the register-assembled im2col ----------
    x = x_ref[...].astype(jnp.float32)            # [C_in, L] raw (residual branch)
    xa = jnp.maximum(x, 0.0)                      # ReLU (affine1 == Identity)
    if C_in_pad > C_in:                           # pad to 8 sublanes per tap block
        xa = jnp.concatenate(
            [xa, jnp.zeros((C_in_pad - C_in, L), jnp.float32)], axis=0)
    a1 = jnp.concatenate([tap_block(xa, kh, kw) for kh, kw in taps]
                         + [ones_row], axis=0).astype(mm_dtype)
    h1 = jnp.dot(w1_ref[...], a1, preferred_element_type=jnp.float32)
    h1 = jnp.maximum(h1, 0.0)                     # ReLU (affine2 == Identity)

    # ---- conv2 with the 1x1 residual and both biases fused in --------------
    if C_out_pad > C_out:
        h1 = jnp.concatenate(
            [h1, jnp.zeros((C_out_pad - C_out, L), jnp.float32)], axis=0)
    a2 = jnp.concatenate([tap_block(h1, kh, kw) for kh, kw in taps]
                         + [x, ones_row], axis=0).astype(mm_dtype)
    out = jnp.dot(w2_ref[...], a2, preferred_element_type=jnp.float32)

    o_ref[...] = out.astype(o_ref.dtype)          # lane-dense [C_out, L] store


def _pick_block_b(B, HW, C_in, C_out, C_in_pad, C_out_pad, K, cores):
    """Images per grid step.

    Big enough to amortize the ~0.35us per-step overhead, small enough to stay
    inside the VMEM budget (including the im2col operands), and -- only on
    dual-TensorCore chips -- split into >= `cores` "parallel" grid steps."""
    lane_bytes = 4 * HW
    n1 = K * K * C_in_pad + 1
    n2 = K * K * C_out_pad + C_in + 1
    per_img = (2 * (C_in + C_out)                 # double-buffered in/out blocks
               + n1 + n2                          # the two im2col operands
               + C_in_pad + C_out_pad + C_out     # activations / result
               ) * lane_bytes
    budget = 24 << 20
    cap = max(1, budget // max(1, per_img))
    if cores > 1 and B >= cores:
        cap = min(cap, max(1, B // cores))        # keep >= `cores` parallel steps

    # Lane block must be 128-divisible unless it equals the full lane extent.
    candidates = [d for d in range(1, B + 1)
                  if B % d == 0 and (d == B or (d * HW) % 128 == 0)]
    fitting = [d for d in candidates if d <= cap]
    return max(fitting) if fitting else min(candidates)


def double_convblock_forward(x_nchw, w1, b1, w2, b2, w_res=None, b_res=None, *,
                             kernel, use_bf16_matmul=True):
    """DoubleConvBlock forward.  x_nchw: [B, C_in, H, W] -> [B, C_out, H, W].

    w1: [C_out, C_in, K, K], w2: [C_out, C_out, K, K].
    w_res/b_res: 1x1 residual conv params when C_in != C_out; None -> identity.
    use_bf16_matmul: bf16 MXU operands with f32 accumulation (~1e-3 rel error);
                     False keeps bit-tight f32 matmuls.
    """
    B, C_in, H, W = x_nchw.shape
    C_out = w1.shape[0]
    K = kernel
    assert K % 2 == 1, "PyTorch 'same' padding (K-1)//2 assumes an odd kernel"
    HW = H * W
    mm_dtype = jnp.bfloat16 if use_bf16_matmul else jnp.float32

    C_in_pad = _round_up(C_in, 8)
    C_out_pad = _round_up(C_out, 8)
    N1 = K * K * C_in_pad + 1                     # + bias column
    N2 = K * K * C_out_pad + C_in + 1             # + residual columns + bias column

    # ---- weight / bias packing (tiny, once per call, plain JAX) -------------
    # Columns follow im2col row order: (kh, kw, channel padded to 8), then bias.
    w1t = jnp.transpose(w1, (0, 2, 3, 1)).astype(jnp.float32)      # [Co,K,K,Ci]
    w1t = jnp.pad(w1t, ((0, 0), (0, 0), (0, 0), (0, C_in_pad - C_in)))
    w1p = jnp.concatenate([w1t.reshape(C_out, K * K * C_in_pad),
                           b1.reshape(C_out, 1).astype(jnp.float32)],
                          axis=1).astype(mm_dtype)

    w2t = jnp.transpose(w2, (0, 2, 3, 1)).astype(jnp.float32)      # [Co,K,K,Co]
    w2t = jnp.pad(w2t, ((0, 0), (0, 0), (0, 0), (0, C_out_pad - C_out)))
    if w_res is None:
        assert C_in == C_out, "Identity residual requires C_in == C_out"
        wr = jnp.eye(C_out, C_in, dtype=jnp.float32)
        br = jnp.zeros((C_out,), jnp.float32)
    else:
        wr = w_res.reshape(C_out, C_in).astype(jnp.float32)
        br = b_res.astype(jnp.float32)
    w2p = jnp.concatenate([w2t.reshape(C_out, K * K * C_out_pad),
                           wr,
                           (b2.astype(jnp.float32) + br).reshape(C_out, 1)],
                          axis=1).astype(mm_dtype)

    # ---- input: channels on sublanes, (image, y, x) stacked on lanes --------
    x_t = jnp.transpose(x_nchw.reshape(B, C_in, HW), (1, 0, 2)).reshape(C_in, B * HW)

    cores = _tensorcores_per_chip()
    block_b = _pick_block_b(B, HW, C_in, C_out, C_in_pad, C_out_pad, K, cores)
    grid = (B // block_b,)
    L = block_b * HW

    # VMEM limit sized from the actual per-step allocation (with 2x headroom).
    vmem_est = (4 * L * (2 * (C_in + C_out) + N1 + N2 + C_in_pad + C_out_pad + C_out)
                + 2 * 4 * C_out * (N1 + N2))
    vmem_limit = int(min(64 << 20, max(32 << 20, 2 * vmem_est)))

    kernel_fn = functools.partial(
        _double_convblock_kernel, H=H, W=W, K=K, C_in=C_in, C_out=C_out,
        C_in_pad=C_in_pad, C_out_pad=C_out_pad, block_b=block_b,
        mm_dtype=mm_dtype)

    out2 = pl.pallas_call(
        kernel_fn,
        out_shape=jax.ShapeDtypeStruct((C_out, B * HW), x_nchw.dtype),
        grid=grid,
        in_specs=[
            pl.BlockSpec((C_in, L), lambda b: (0, b)),
            pl.BlockSpec((C_out, N1), lambda b: (0, 0)),
            pl.BlockSpec((C_out, N2), lambda b: (0, 0)),
        ],
        out_specs=pl.BlockSpec((C_out, L), lambda b: (0, b)),
        compiler_params=pltpu.CompilerParams(
            dimension_semantics=("parallel",),
            vmem_limit_bytes=vmem_limit),
    )(x_t, w1p, w2p)

    return jnp.transpose(out2.reshape(C_out, B, H, W), (1, 0, 2, 3))


def _reference(x, w1, b1, w2, b2, w_res, b_res, *, kernel):
    """Pure-JAX reference of the PyTorch DoubleConvBlock forward."""
    pad = (kernel - 1) // 2
    dn = ("NCHW", "OIHW", "NCHW")
    h = lax.conv_general_dilated(
        jnp.maximum(x, 0.0), w1, window_strides=(1, 1),
        padding=[(pad, pad), (pad, pad)], dimension_numbers=dn)
    h = h + b1.reshape(1, -1, 1, 1)
    h = lax.conv_general_dilated(
        jnp.maximum(h, 0.0), w2, window_strides=(1, 1),
        padding=[(pad, pad), (pad, pad)], dimension_numbers=dn)
    h = h + b2.reshape(1, -1, 1, 1)
    if w_res is None:
        r = x
    else:
        r = lax.conv_general_dilated(
            x, w_res, window_strides=(1, 1), padding=[(0, 0), (0, 0)],
            dimension_numbers=dn) + b_res.reshape(1, -1, 1, 1)
    return h + r


if __name__ == "__main__":
    # DoubleConvBlock(in_channels=4, out_channels=8, kernel=3, affine=False)
    # -> residual path is a 1x1 conv (C_in != C_out).
    B, C_in, C_out, H, W, K = 2, 4, 8, 16, 16, 3

    key = jax.random.PRNGKey(0)
    kx, k1w, k1b, k2w, k2b, krw, krb, kx2, k3w = jax.random.split(key, 9)
    x = jax.random.normal(kx, (B, C_in, H, W), jnp.float32)
    w1 = jax.random.normal(k1w, (C_out, C_in, K, K), jnp.float32) * 0.1
    b1 = jax.random.normal(k1b, (C_out,), jnp.float32) * 0.1
    w2 = jax.random.normal(k2w, (C_out, C_out, K, K), jnp.float32) * 0.1
    b2 = jax.random.normal(k2b, (C_out,), jnp.float32) * 0.1
    w_res = jax.random.normal(krw, (C_out, C_in, 1, 1), jnp.float32) * 0.1
    b_res = jax.random.normal(krb, (C_out,), jnp.float32) * 0.1

    ref = _reference(x, w1, b1, w2, b2, w_res, b_res, kernel=K)

    # 1) Exact path (f32 MXU operands): must match the f32 reference tightly.
    out_f32 = double_convblock_forward(x, w1, b1, w2, b2, w_res, b_res,
                                       kernel=K, use_bf16_matmul=False)
    out_f32 = jax.block_until_ready(out_f32)
    assert out_f32.shape == (B, C_out, H, W)
    err_f32 = float(jnp.max(jnp.abs(out_f32 - ref)))
    assert err_f32 < 2e-4, err_f32

    # 2) Fast path (bf16 MXU operands, f32 accumulate) -- the default.
    out_bf16 = double_convblock_forward(x, w1, b1, w2, b2, w_res, b_res,
                                        kernel=K)
    out_bf16 = jax.block_until_ready(out_bf16)
    err_bf16 = float(jnp.max(jnp.abs(out_bf16 - ref)))
    assert err_bf16 < 1e-1, err_bf16

    # 3) Identity-residual variant (C_in == C_out, residual = nn.Identity).
    x2 = jax.random.normal(kx2, (B, C_out, H, W), jnp.float32)
    w1b = jax.random.normal(k3w, (C_out, C_out, K, K), jnp.float32) * 0.1
    ref2 = _reference(x2, w1b, b1, w2, b2, None, None, kernel=K)
    out2 = double_convblock_forward(x2, w1b, b1, w2, b2, None, None,
                                    kernel=K, use_bf16_matmul=False)
    out2 = jax.block_until_ready(out2)
    err2 = float(jnp.max(jnp.abs(out2 - ref2)))
    assert err2 < 2e-4, err2

    print("KERNEL_OK")
</pallas_src>

<mosaic_0001>
module attributes {stable_mosaic.version = 11 : i64} {
  func.func @_double_convblock_kernel(%arg0: i32, %arg1: memref<4x512xf32, #tpu.memory_space<vmem>>, %arg2: memref<8x73xf32, #tpu.memory_space<vmem>>, %arg3: memref<8x77xf32, #tpu.memory_space<vmem>>, %arg4: memref<8x512xf32, #tpu.memory_space<vmem>>) attributes {dimension_semantics = [#tpu.dimension_semantics<parallel>], iteration_bounds = array<i64: 1>, scalar_prefetch = 0 : i64, scratch_operands = 0 : i64, tpu.core_type = #tpu.core_type<tc>, window_params = [{transform_indices = @transform_0, window_bounds = array<i64: 4, 512>}, {pipeline_mode = #tpu.pipeline_mode<synchronous>, transform_indices = @transform_1, window_bounds = array<i64: 8, 73>}, {pipeline_mode = #tpu.pipeline_mode<synchronous>, transform_indices = @transform_2, window_bounds = array<i64: 8, 77>}, {transform_indices = @transform_3, window_bounds = array<i64: 8, 512>}]} {
    %0 = tpu.iota {dimensions = array<i32: 1>} : vector<1x512xi32>
    %c255_i32 = arith.constant 255 : i32
    %1 = vector.broadcast %c255_i32 : i32 to vector<1x512xi32>
    %2 = arith.andi %0, %1 : vector<1x512xi32>
    %c4_i32 = arith.constant 4 : i32
    %3 = vector.broadcast %c4_i32 : i32 to vector<1x512xi32>
    %4 = arith.shrsi %2, %3 : vector<1x512xi32>
    %c15_i32 = arith.constant 15 : i32
    %5 = vector.broadcast %c15_i32 : i32 to vector<1x512xi32>
    %6 = arith.andi %2, %5 : vector<1x512xi32>
    %c1_i32 = arith.constant 1 : i32
    %7 = vector.broadcast %c1_i32 : i32 to vector<1x512xi32>
    %8 = arith.cmpi sge, %4, %7 : vector<1x512xi32>
    %c1_i32_0 = arith.constant 1 : i32
    %9 = vector.broadcast %c1_i32_0 : i32 to vector<1x512xi32>
    %10 = arith.cmpi sge, %6, %9 : vector<1x512xi32>
    %11 = arith.andi %8, %10 : vector<1x512xi1>
    %c1_i32_1 = arith.constant 1 : i32
    %12 = vector.broadcast %c1_i32_1 : i32 to vector<1x512xi32>
    %13 = arith.cmpi sge, %4, %12 : vector<1x512xi32>
    %c1_i32_2 = arith.constant 1 : i32
    %14 = vector.broadcast %c1_i32_2 : i32 to vector<1x512xi32>
    %15 = arith.cmpi sge, %4, %14 : vector<1x512xi32>
    %c15_i32_3 = arith.constant 15 : i32
    %16 = vector.broadcast %c15_i32_3 : i32 to vector<1x512xi32>
    %17 = arith.cmpi slt, %6, %16 : vector<1x512xi32>
    %18 = arith.andi %15, %17 : vector<1x512xi1>
    %c1_i32_4 = arith.constant 1 : i32
    %19 = vector.broadcast %c1_i32_4 : i32 to vector<1x512xi32>
    %20 = arith.cmpi sge, %6, %19 : vector<1x512xi32>
    %c15_i32_5 = arith.constant 15 : i32
    %21 = vector.broadcast %c15_i32_5 : i32 to vector<1x512xi32>
    %22 = arith.cmpi slt, %6, %21 : vector<1x512xi32>
    %c15_i32_6 = arith.constant 15 : i32
    %23 = vector.broadcast %c15_i32_6 : i32 to vector<1x512xi32>
    %24 = arith.cmpi slt, %4, %23 : vector<1x512xi32>
    %c1_i32_7 = arith.constant 1 : i32
    %25 = vector.broadcast %c1_i32_7 : i32 to vector<1x512xi32>
    %26 = arith.cmpi sge, %6, %25 : vector<1x512xi32>
    %27 = arith.andi %24, %26 : vector<1x512xi1>
    %c15_i32_8 = arith.constant 15 : i32
    %28 = vector.broadcast %c15_i32_8 : i32 to vector<1x512xi32>
    %29 = arith.cmpi slt, %4, %28 : vector<1x512xi32>
    %c15_i32_9 = arith.constant 15 : i32
    %30 = vector.broadcast %c15_i32_9 : i32 to vector<1x512xi32>
    %31 = arith.cmpi slt, %4, %30 : vector<1x512xi32>
    %c15_i32_10 = arith.constant 15 : i32
    %32 = vector.broadcast %c15_i32_10 : i32 to vector<1x512xi32>
    %33 = arith.cmpi slt, %6, %32 : vector<1x512xi32>
    %34 = arith.andi %31, %33 : vector<1x512xi1>
    %cst = arith.constant 1.000000e+00 : f32
    %35 = vector.broadcast %cst : f32 to vector<1x512xf32>
    %c0 = arith.constant 0 : index
    %c0_11 = arith.constant 0 : index
    %36 = vector.load %arg1[%c0, %c0_11] : memref<4x512xf32, #tpu.memory_space<vmem>>, vector<4x512xf32>
    %cst_12 = arith.constant 0.000000e+00 : f32
    %37 = vector.broadcast %cst_12 : f32 to vector<4x512xf32>
    %38 = arith.maximumf %36, %37 : vector<4x512xf32>
    %cst_13 = arith.constant 0.000000e+00 : f32
    %39 = vector.broadcast %cst_13 : f32 to vector<4x512xf32>
    %40 = tpu.concatenate %38, %39 in 0 : vector<4x512xf32>, vector<4x512xf32> -> vector<8x512xf32>
    %c17_i32 = arith.constant 17 : i32
    %41 = tpu.dynamic_rotate %40 by %c17_i32 dim 1 : vector<8x512xf32>, i32 -> vector<8x512xf32>
    %cst_14 = arith.constant 0.000000e+00 : f32
    %42 = vector.shape_cast %11 : vector<1x512xi1> to vector<1x512xi1>
    %43 = vector.broadcast %42 : vector<1x512xi1> to vector<8x512xi1>
    %44 = vector.broadcast %cst_14 : f32 to vector<8x512xf32>
    %45 = arith.select %43, %41, %44 : vector<8x512xi1>, vector<8x512xf32>
    %c16_i32 = arith.constant 16 : i32
    %46 = tpu.dynamic_rotate %40 by %c16_i32 dim 1 : vector<8x512xf32>, i32 -> vector<8x512xf32>
    %cst_15 = arith.constant 0.000000e+00 : f32
    %47 = vector.shape_cast %13 : vector<1x512xi1> to vector<1x512xi1>
    %48 = vector.broadcast %47 : vector<1x512xi1> to vector<8x512xi1>
    %49 = vector.broadcast %cst_15 : f32 to vector<8x512xf32>
    %50 = arith.select %48, %46, %49 : vector<8x512xi1>, vector<8x512xf32>
    %c15_i32_16 = arith.constant 15 : i32
    %51 = tpu.dynamic_rotate %40 by %c15_i32_16 dim 1 : vector<8x512xf32>, i32 -> vector<8x512xf32>
    %cst_17 = arith.constant 0.000000e+00 : f32
    %52 = vector.shape_cast %18 : vector<1x512xi1> to vector<1x512xi1>
    %53 = vector.broadcast %52 : vector<1x512xi1> to vector<8x512xi1>
    %54 = vector.broadcast %cst_17 : f32 to vector<8x512xf32>
    %55 = arith.select %53, %51, %54 : vector<8x512xi1>, vector<8x512xf32>
    %c1_i32_18 = arith.constant 1 : i32
    %56 = tpu.dynamic_rotate %40 by %c1_i32_18 dim 1 : vector<8x512xf32>, i32 -> vector<8x512xf32>
    %cst_19 = arith.constant 0.000000e+00 : f32
    %57 = vector.shape_cast %20 : vector<1x512xi1> to vector<1x512xi1>
    %58 = vector.broadcast %57 : vector<1x512xi1> to vector<8x512xi1>
    %59 = vector.broadcast %cst_19 : f32 to vector<8x512xf32>
    %60 = arith.select %58, %56, %59 : vector<8x512xi1>, vector<8x512xf32>
    %c511_i32 = arith.constant 511 : i32
    %61 = tpu.dynamic_rotate %40 by %c511_i32 dim 1 : vector<8x512xf32>, i32 -> vector<8x512xf32>
    %cst_20 = arith.constant 0.000000e+00 : f32
    %62 = vector.shape_cast %22 : vector<1x512xi1> to vector<1x512xi1>
    %63 = vector.broadcast %62 : vector<1x512xi1> to vector<8x512xi1>
    %64 = vector.broadcast %cst_20 : f32 to vector<8x512xf32>
    %65 = arith.select %63, %61, %64 : vector<8x512xi1>, vector<8x512xf32>
    %c497_i32 = arith.constant 497 : i32
    %66 = tpu.dynamic_rotate %40 by %c497_i32 dim 1 : vector<8x512xf32>, i32 -> vector<8x512xf32>
    %cst_21 = arith.constant 0.000000e+00 : f32
    %67 = vector.shape_cast %27 : vector<1x512xi1> to vector<1x512xi1>
    %68 = vector.broadcast %67 : vector<1x512xi1> to vector<8x512xi1>
    %69 = vector.broadcast %cst_21 : f32 to vector<8x512xf32>
    %70 = arith.select %68, %66, %69 : vector<8x512xi1>, vector<8x512xf32>
    %c496_i32 = arith.constant 496 : i32
    %71 = tpu.dynamic_rotate %40 by %c496_i32 dim 1 : vector<8x512xf32>, i32 -> vector<8x512xf32>
    %cst_22 = arith.constant 0.000000e+00 : f32
    %72 = vector.shape_cast %29 : vector<1x512xi1> to vector<1x512xi1>
    %73 = vector.broadcast %72 : vector<1x512xi1> to vector<8x512xi1>
    %74 = vector.broadcast %cst_22 : f32 to vector<8x512xf32>
    %75 = arith.select %73, %71, %74 : vector<8x512xi1>, vector<8x512xf32>
    %c495_i32 = arith.constant 495 : i32
    %76 = tpu.dynamic_rotate %40 by %c495_i32 dim 1 : vector<8x512xf32>, i32 -> vector<8x512xf32>
    %cst_23 = arith.constant 0.000000e+00 : f32
    %77 = vector.shape_cast %34 : vector<1x512xi1> to vector<1x512xi1>
    %78 = vector.broadcast %77 : vector<1x512xi1> to vector<8x512xi1>
    %79 = vector.broadcast %cst_23 : f32 to vector<8x512xf32>
    %80 = arith.select %78, %76, %79 : vector<8x512xi1>, vector<8x512xf32>
    %81 = tpu.concatenate %45, %50, %55, %60, %40, %65, %70, %75, %80, %35 in 0 : vector<8x512xf32>, vector<8x512xf32>, vector<8x512xf32>, vector<8x512xf32>, vector<8x512xf32>, vector<8x512xf32>, vector<8x512xf32>, vector<8x512xf32>, vector<8x512xf32>, vector<1x512xf32> -> vector<73x512xf32>
    %c0_24 = arith.constant 0 : index
    %c0_25 = arith.constant 0 : index
    %82 = vector.load %arg2[%c0_24, %c0_25] : memref<8x73xf32, #tpu.memory_space<vmem>>, vector<8x73xf32>
    %cst_26 = arith.constant dense<0.000000e+00> : vector<8x512xf32>
    %83 = tpu.matmul %82, %81, %cst_26 {dimension_numbers = #tpu.dot_dimension_numbers<[1], [0], [0], [1], [0, 0, 1, 1], [], []>} : vector<8x73xf32>, vector<73x512xf32>, vector<8x512xf32> -> vector<8x512xf32>
    %cst_27 = arith.constant 0.000000e+00 : f32
    %84 = vector.broadcast %cst_27 : f32 to vector<8x512xf32>
    %85 = arith.maximumf %83, %84 : vector<8x512xf32>
    %c17_i32_28 = arith.constant 17 : i32
    %86 = tpu.dynamic_rotate %85 by %c17_i32_28 dim 1 : vector<8x512xf32>, i32 -> vector<8x512xf32>
    %cst_29 = arith.constant 0.000000e+00 : f32
    %87 = vector.shape_cast %11 : vector<1x512xi1> to vector<1x512xi1>
    %88 = vector.broadcast %87 : vector<1x512xi1> to vector<8x512xi1>
    %89 = vector.broadcast %cst_29 : f32 to vector<8x512xf32>
    %90 = arith.select %88, %86, %89 : vector<8x512xi1>, vector<8x512xf32>
    %c16_i32_30 = arith.constant 16 : i32
    %91 = tpu.dynamic_rotate %85 by %c16_i32_30 dim 1 : vector<8x512xf32>, i32 -> vector<8x512xf32>
    %cst_31 = arith.constant 0.000000e+00 : f32
    %92 = vector.shape_cast %13 : vector<1x512xi1> to vector<1x512xi1>
    %93 = vector.broadcast %92 : vector<1x512xi1> to vector<8x512xi1>
    %94 = vector.broadcast %cst_31 : f32 to vector<8x512xf32>
    %95 = arith.select %93, %91, %94 : vector<8x512xi1>, vector<8x512xf32>
    %c15_i32_32 = arith.constant 15 : i32
    %96 = tpu.dynamic_rotate %85 by %c15_i32_32 dim 1 : vector<8x512xf32>, i32 -> vector<8x512xf32>
    %cst_33 = arith.constant 0.000000e+00 : f32
    %97 = vector.shape_cast %18 : vector<1x512xi1> to vector<1x512xi1>
    %98 = vector.broadcast %97 : vector<1x512xi1> to vector<8x512xi1>
    %99 = vector.broadcast %cst_33 : f32 to vector<8x512xf32>
    %100 = arith.select %98, %96, %99 : vector<8x512xi1>, vector<8x512xf32>
    %c1_i32_34 = arith.constant 1 : i32
    %101 = tpu.dynamic_rotate %85 by %c1_i32_34 dim 1 : vector<8x512xf32>, i32 -> vector<8x512xf32>
    %cst_35 = arith.constant 0.000000e+00 : f32
    %102 = vector.shape_cast %20 : vector<1x512xi1> to vector<1x512xi1>
    %103 = vector.broadcast %102 : vector<1x512xi1> to vector<8x512xi1>
    %104 = vector.broadcast %cst_35 : f32 to vector<8x512xf32>
    %105 = arith.select %103, %101, %104 : vector<8x512xi1>, vector<8x512xf32>
    %c511_i32_36 = arith.constant 511 : i32
    %106 = tpu.dynamic_rotate %85 by %c511_i32_36 dim 1 : vector<8x512xf32>, i32 -> vector<8x512xf32>
    %cst_37 = arith.constant 0.000000e+00 : f32
    %107 = vector.shape_cast %22 : vector<1x512xi1> to vector<1x512xi1>
    %108 = vector.broadcast %107 : vector<1x512xi1> to vector<8x512xi1>
    %109 = vector.broadcast %cst_37 : f32 to vector<8x512xf32>
    %110 = arith.select %108, %106, %109 : vector<8x512xi1>, vector<8x512xf32>
    %c497_i32_38 = arith.constant 497 : i32
    %111 = tpu.dynamic_rotate %85 by %c497_i32_38 dim 1 : vector<8x512xf32>, i32 -> vector<8x512xf32>
    %cst_39 = arith.constant 0.000000e+00 : f32
    %112 = vector.shape_cast %27 : vector<1x512xi1> to vector<1x512xi1>
    %113 = vector.broadcast %112 : vector<1x512xi1> to vector<8x512xi1>
    %114 = vector.broadcast %cst_39 : f32 to vector<8x512xf32>
    %115 = arith.select %113, %111, %114 : vector<8x512xi1>, vector<8x512xf32>
    %c496_i32_40 = arith.constant 496 : i32
    %116 = tpu.dynamic_rotate %85 by %c496_i32_40 dim 1 : vector<8x512xf32>, i32 -> vector<8x512xf32>
    %cst_41 = arith.constant 0.000000e+00 : f32
    %117 = vector.shape_cast %29 : vector<1x512xi1> to vector<1x512xi1>
    %118 = vector.broadcast %117 : vector<1x512xi1> to vector<8x512xi1>
    %119 = vector.broadcast %cst_41 : f32 to vector<8x512xf32>
    %120 = arith.select %118, %116, %119 : vector<8x512xi1>, vector<8x512xf32>
    %c495_i32_42 = arith.constant 495 : i32
    %121 = tpu.dynamic_rotate %85 by %c495_i32_42 dim 1 : vector<8x512xf32>, i32 -> vector<8x512xf32>
    %cst_43 = arith.constant 0.000000e+00 : f32
    %122 = vector.shape_cast %34 : vector<1x512xi1> to vector<1x512xi1>
    %123 = vector.broadcast %122 : vector<1x512xi1> to vector<8x512xi1>
    %124 = vector.broadcast %cst_43 : f32 to vector<8x512xf32>
    %125 = arith.select %123, %121, %124 : vector<8x512xi1>, vector<8x512xf32>
    %126 = tpu.concatenate %90, %95, %100, %105, %85, %110, %115, %120, %125, %36, %35 in 0 : vector<8x512xf32>, vector<8x512xf32>, vector<8x512xf32>, vector<8x512xf32>, vector<8x512xf32>, vector<8x512xf32>, vector<8x512xf32>, vector<8x512xf32>, vector<8x512xf32>, vector<4x512xf32>, vector<1x512xf32> -> vector<77x512xf32>
    %c0_44 = arith.constant 0 : index
    %c0_45 = arith.constant 0 : index
    %127 = vector.load %arg3[%c0_44, %c0_45] : memref<8x77xf32, #tpu.memory_space<vmem>>, vector<8x77xf32>
    %cst_46 = arith.constant dense<0.000000e+00> : vector<8x512xf32>
    %128 = tpu.matmul %127, %126, %cst_46 {dimension_numbers = #tpu.dot_dimension_numbers<[1], [0], [0], [1], [0, 0, 1, 1], [], []>} : vector<8x77xf32>, vector<77x512xf32>, vector<8x512xf32> -> vector<8x512xf32>
    %c0_47 = arith.constant 0 : index
    %c0_48 = arith.constant 0 : index
    %129 = vector.load %arg4[%c0_47, %c0_48] : memref<8x512xf32, #tpu.memory_space<vmem>>, vector<8x512xf32>
    tpu.vector_store %arg4[%c0_47, %c0_48], %128 {strides = array<i32>} : memref<8x512xf32, #tpu.memory_space<vmem>>, vector<8x512xf32>,
    return
  }
  func.func @transform_0(%arg0: i32) -> (i32, i32) {
    %c0_i32 = arith.constant 0 : i32
    %c0_i32_0 = arith.constant 0 : i32
    return %c0_i32, %arg0 : i32, i32
  }
  func.func @transform_1(%arg0: i32) -> (i32, i32) {
    %c0_i32 = arith.constant 0 : i32
    %c0_i32_0 = arith.constant 0 : i32
    %c0_i32_1 = arith.constant 0 : i32
    return %c0_i32, %c0_i32_0 : i32, i32
  }
  func.func @transform_2(%arg0: i32) -> (i32, i32) {
    %c0_i32 = arith.constant 0 : i32
    %c0_i32_0 = arith.constant 0 : i32
    %c0_i32_1 = arith.constant 0 : i32
    return %c0_i32, %c0_i32_0 : i32, i32
  }
  func.func @transform_3(%arg0: i32) -> (i32, i32) {
    %c0_i32 = arith.constant 0 : i32
    %c0_i32_0 = arith.constant 0 : i32
    return %c0_i32, %arg0 : i32, i32
  }
}

</mosaic_0001>

<bundles_post_ra>
// kernel: tpu_custom_call.1
= control target key start
LH: loop header
LB: loop body
LE: loop exit
PB: predicated region body
PF: predicated region fallthrough
CT: control target
= control target key end

     0   :  { %8 = vsyncpa [#allocation3], 0  ;;  %s1945_s0 = inlined_call_operand.hbm [shape: f32[4,512], index: 0, kind: input, shape index: {}]   ;;  %s1946_s1 = inlined_call_operand.hbm [shape: f32[8,73], index: 1, kind: input, shape index: {}]   ;;  %s1947_s2 = inlined_call_operand.hbm [shape: f32[8,77], index: 2, kind: input, shape index: {}]   ;;  %s1948_s3 = inlined_call_operand.hbm [shape: f32[8,512], index: 3, kind: output, shape index: {}]  }
   0x1   :  { %9 = vsyncpa [#allocation6], 0 }
   0x2   :  { %10 = vsyncpa [#allocation4], 0  ;;  %s1258_s12 = smov [#allocation5]   ;;  %s1259_s14 = smov [#allocation2]  }
   0x3   :  { %s27_s13 = sshll.u32 %s1258_s12, 4  ;;  %s17_s15 = sshll.u32 %s1259_s14, 4  ;;  %s28_s13 = int_to_ptr.vmem [resolvable:$true] %s27_s13  ;;  %s18_s15 = int_to_ptr.vmem [resolvable:$true] %s17_s15 }
   0x4   :  { %s1164_s18 = scalar_lea.hbm %s1946_s1, 128 }
   0x5   :  { %p1165_p0 = scmp.ne.s32.totalorder %s1946_s1, %s1164_s18  ;;  %p1168_p1 = scmp.lt.u32.totalorder %s1164_s18, %s1946_s1 }
   0x7   :  { %p1170_p2 = pnand %p1168_p1, %p1165_p0 }
   0x9   :  { %1173 = shalt.err (!%p1170_p2)
}
   0xa   :  { %s1174_s23 = scalar_lea.vmem %s28_s13, 128  ;;  %p1179_p4 = scmp.lt.s32.totalorder %s28_s13, %s28_s13 }
   0xb   :  { %p1175_p3 = scmp.ne.s32.totalorder %s28_s13, %s1174_s23  ;;  %p1180_p5 = scmp.lt.s32.totalorder %s1174_s23, %s1174_s23 }
   0xd   :  { %p1181_p6 = por %p1180_p5, %p1179_p4 }
   0xf   :  { %p1182_p7 = pnand %p1181_p6, %p1175_p3 }
  0x11   :  { %1185 = shalt.err (!%p1182_p7)
}
  0x12   :  { %30 = dma.hbm_to_vmem [thread:$0]  %s1946_s1, 128, %s28_s13, [#allocation6]  }
  0x13   :  { %s1186_s28 = scalar_lea.hbm %s1945_s0, 256 }
  0x14   :  { %p1187_p8 = scmp.ne.s32.totalorder %s1945_s0, %s1186_s28  ;;  %p1190_p9 = scmp.lt.u32.totalorder %s1186_s28, %s1945_s0 }
  0x16   :  { %p1192_p10 = pnand %p1190_p9, %p1187_p8 }
  0x18   :  { %1195 = shalt.err (!%p1192_p10)
}
  0x19   :  { %s1196_s6 = scalar_lea.vmem %s18_s15, 256  ;;  %p1201_p12 = scmp.lt.s32.totalorder %s18_s15, %s18_s15 }
  0x1a   :  { %p1197_p11 = scmp.ne.s32.totalorder %s18_s15, %s1196_s6  ;;  %p1202_p13 = scmp.lt.s32.totalorder %s1196_s6, %s1196_s6 }
  0x1c   :  { %p1203_p0 = por %p1202_p13, %p1201_p12 }
  0x1e   :  { %p1204_p1 = pnand %p1203_p0, %p1197_p11 }
  0x20   :  { %1207 = shalt.err (!%p1204_p1)
}
  0x21   :  { %20 = dma.hbm_to_vmem [thread:$0]  %s1945_s0, 256, %s18_s15, [#allocation3]  }
  0x22   :  { %s1260_s8 = smov [#allocation7]   ;;  %s1208_s12 = scalar_lea.hbm %s1947_s2, 128 }
  0x23   :  { %s37_s9 = sshll.u32 %s1260_s8, 4  ;;  %p1209_p2 = scmp.ne.s32.totalorder %s1947_s2, %s1208_s12  ;;  %s38_s9 = int_to_ptr.vmem [resolvable:$true] %s37_s9 }
  0x24   :  { %p1212_p3 = scmp.lt.u32.totalorder %s1208_s12, %s1947_s2 }
  0x26   :  { %p1214_p4 = pnand %p1212_p3, %p1209_p2 }
  0x28   :  { %1217 = shalt.err (!%p1214_p4)
}
  0x29   :  { %s1218_s18 = scalar_lea.vmem %s38_s9, 128  ;;  %p1223_p6 = scmp.lt.s32.totalorder %s38_s9, %s38_s9 }
  0x2a   :  { %p1219_p5 = scmp.ne.s32.totalorder %s38_s9, %s1218_s18  ;;  %p1224_p7 = scmp.lt.s32.totalorder %s1218_s18, %s1218_s18 }
  0x2c   :  { %p1225_p8 = por %p1224_p7, %p1223_p6 }
  0x2e   :  { %p1226_p9 = pnand %p1225_p8, %p1219_p5 }
  0x30   :  { %1229 = shalt.err (!%p1226_p9)
}
  0x31   :  { %40 = dma.hbm_to_vmem [thread:$0]  %s1947_s2, 128, %s38_s9, [#allocation6]  }
  0x32   :  { %1252 = dma.done.wait [#allocation3], 256  }
  0x33   :  { %1253 = vsyncadd [#allocation3], 4294967040 }
  0x34   :  { %1254 = dma.done.wait [#allocation6], 256  }
  0x35   :  { %1255 = vsyncadd [#allocation6], 4294967040  ;;  %v1329_v0 = vld [vmem:[#allocation2] sm:$0xff]  ;;  %vm1949_vm0 = vcmask 1043456   ;;  %v1331_v1 = vld [vmem:[#allocation2 + $0x8] sm:$0xff]  ;;  %s1261_s2 = smov 16   ;;  %v50_v13 = vlaneseq }
  0x36   :  { %v1334_v2 = vmax.f32 %v1329_v0, 0.0  ;;  %v1337_v3 = vmax.f32 %v1331_v1, 0.0  ;;  %s1262_s19 = smov 17   ;;  %s1263_s20 = smov 15   ;;  %v1267_v12 = vmov 0.0   ;;  %v1973_v33 = vmov 0 }
  0x37   :  { %s1264_s21 = smov 1   ;;  %s1265_s22 = smov 127   ;;  %387 = vmatprep.mubr.f32.mxu0 %v1267_v12  ;;  %458 = vmatprep.mubr.f32.mxu1 %v1267_v12  ;;  %v1373_v14 = vand.u32 127, %v50_v13  ;;  %v1977_v48 = vmov 0  ;;  %v1979_v49 = vmov 0  ;;  %v1981_v54 = vmov 0 }
  0x38   :  { %v1341_v4 = vcombine.high %v1334_v2, %v1334_v2  ;;  %v110_v5 = vsel %vm1949_vm0, %v1334_v2, 0.0  ;;  %v1347_v6 = vcombine.high %v1337_v3, %v1337_v3  ;;  %v112_v8 = vsel %vm1949_vm0, %v1337_v3, 0.0  ;;  %s1266_s23 = smov 113   ;;  %s1268_s24 = smov 112  }
  0x39   :  { %s1269_s25 = smov 111   ;;  %v52_v15 = vadd.s32 128, %v1373_v14  ;;  %v55_v16 = vand.u32 255, %v1373_v14  ;;  %v54_v18 = vadd.s32 384, %v1373_v14  ;;  %v53_v19 = vadd.s32 256, %v1373_v14  ;;  %s1272_s26 = smov [#allocation8]  }
  0x3a   :  { %v111_v7 = vsel %vm1949_vm0, %v1341_v4, 0.0  ;;  %v113_v9 = vsel %vm1949_vm0, %v1347_v6, 0.0  ;;  %vm1955_vm7 = vcmp.lt.s32.totalorder %v1373_v14, 17  ;;  %vm1954_vm11 = vcmp.lt.s32.totalorder %v1373_v14, 16  ;;  %s777_s27 = sshll.u32 %s1272_s26, 4  ;;  %s778_s27 = int_to_ptr.vmem [resolvable:$true] %s777_s27 }
  0x3b   :  { %v1012_v10 = vpack.i.bf16 %v111_v7, %v110_v5  ;;  %v1017_v11 = vpack.i.bf16 %v113_v9, %v112_v8  ;;  %v56_v17 = vand.u32 255, %v52_v15  ;;  %v1379_v20 = vshra.s32 %v55_v16, 4  ;;  %s1230_s28 = scalar_lea.vmem %s778_s27, 512  ;;  %p1235_p11 = scmp.lt.s32.totalorder %s778_s27, %s778_s27 }
  0x3c   :  { %v1381_v21 = vand.u32 15, %v55_v16  ;;  %v58_v24 = vand.u32 255, %v54_v18  ;;  %v57_v25 = vand.u32 255, %v53_v19  ;;  %p1231_p10 = scmp.ne.s32.totalorder %s778_s27, %s1230_s28  ;;  %p1236_p12 = scmp.lt.s32.totalorder %s1230_s28, %s1230_s28 }
  0x3d   :  { %1013 = vrot.lane.b32.xlu1 %v1012_v10, %s1261_s2  ;;  %1003 = vrot.lane.b32.xlu0 %v1012_v10, %s1262_s19  ;;  %v1383_v22 = vshra.s32 %v56_v17, 4  ;;  %v1385_v23 = vand.u32 15, %v56_v17  ;;  %vm67_vm1 = vcmp.ge.s32.totalorder %v1379_v20, 1 }
  0x3e   :  { %vm1950_vm2 = vcmp.ge.s32.totalorder %v1381_v21, 1  ;;  %v1391_v26 = vshra.s32 %v58_v24, 4  ;;  %v1393_v27 = vand.u32 15, %v58_v24  ;;  %v1395_v28 = vshra.s32 %v57_v25, 4  ;;  %p1237_p13 = por %p1236_p12, %p1235_p11 }
  0x3f   :  { %vm68_vm3 = vcmp.ge.s32.totalorder %v1383_v22, 1  ;;  %vm1956_vm4 = vcmp.ge.s32.totalorder %v1385_v23, 1  ;;  %v1397_v29 = vand.u32 15, %v57_v25  ;;  %vm75_vm5 = vmand %vm67_vm1, %vm1950_vm2  ;;  %vm1953_vm10 = vcmp.lt.s32.totalorder %v1385_v23, 15 }
  0x40   :  { %vm1407_vm6 = vmand %vm68_vm3, %vm1956_vm4  ;;  %vm70_vm8 = vcmp.ge.s32.totalorder %v1391_v26, 1  ;;  %vm1951_vm9 = vcmp.ge.s32.totalorder %v1393_v27, 1  ;;  %vm69_vm13 = vcmp.ge.s32.totalorder %v1395_v28, 1  ;;  %p1238_p0 = pnand %p1237_p13, %p1231_p10 }
  0x41   :  { %1018 = vrot.lane.b32.xlu1 %v1017_v11, %s1261_s2  ;;  %1008 = vrot.lane.b32.xlu0 %v1017_v11, %s1262_s19  ;;  %vm1418_vm12 = vmpackc.low %vm67_vm1, %vm75_vm5  ;;  %vm1952_vm14 = vcmp.ge.s32.totalorder %v1397_v29, 1 }
  0x42   :  { %v1974_v33 = vsel %vm1418_vm12, 4294967295, %v1973_v33  ;;  %vm1428_vm15 = vmpackc.low %vm68_vm3, %vm1407_vm6  ;;  %vm1959_vm6 = vcmp.lt.s32.totalorder %v1393_v27, 15 }
  0x43   :  { %vm78_vm5 = vmand %vm70_vm8, %vm1951_vm9 }
  0x44   :  { %vm77_vm0 = vmand %vm69_vm13, %vm1952_vm14 }
  0x45   :  { %1028 = vrot.lane.b32.xlu1 %v1017_v11, %s1263_s20  ;;  %1023 = vrot.lane.b32.xlu0 %v1012_v10, %s1263_s20  ;;  %vm84_vm2 = vmand %vm68_vm3, %vm1953_vm10  ;;  %vm1958_vm3 = vcmp.lt.s32.totalorder %v1381_v21, 15  ;;  %vm1957_vm10 = vcmp.lt.s32.totalorder %v1397_v29, 15 }
  0x46   :  { %vm1451_vm9 = vmpackc.low %vm70_vm8, %vm78_vm5 }
  0x47   :  { %v1978_v48 = vsel %vm1451_vm9, 4294967295, %v1977_v48  ;;  %vm1459_vm14 = vmpackc.low %vm69_vm13, %vm77_vm0 }
  0x48   :  { %v1980_v49 = vsel %vm1459_vm14, 4294967295, %v1979_v49  ;;  %vm1475_vm0 = vmpackc.low %vm1956_vm4, %vm84_vm2  ;;  %vm1961_vm4 = vcmp.lt.s32.totalorder %v1373_v14, 1 }
  0x49   :  { %1038 = vrot.lane.b32.xlu1 %v1017_v11, %s1264_s21  ;;  %1033 = vrot.lane.b32.xlu0 %v1012_v10, %s1264_s21  ;;  %v1982_v54 = vsel %vm1475_vm0, 4294967295, %v1981_v54  ;;  %vm86_vm5 = vmand %vm70_vm8, %vm1959_vm6 }
  0x4a   :  { %vm1491_vm2 = vmand %vm67_vm1, %vm1958_vm3  ;;  %vm1960_vm1 = vcmp.lt.s32.totalorder %v1373_v14, 15 }
  0x4b   :  { %vm1503_vm8 = vmand %vm69_vm13, %vm1957_vm10  ;;  %vm1990_vm10 = vcmp.ge.s32.totalorder %v1381_v21, 1  ;;  %vm1993_vm13 = vcmp.ge.s32.totalorder %v1397_v29, 1 }
  0x4c   :  { %vm1522_vm3 = vmpackc.low %vm1990_vm10, %vm1491_vm2  ;;  %vm1996_vm10 = vcmask 1043456   ;;  %vm1997_vm2 = vcmp.lt.s32.totalorder %v1385_v23, 15 }
  0x4d   :  { %1048 = vrot.lane.b32.xlu1 %v1017_v11, %s1265_s22  ;;  %1043 = vrot.lane.b32.xlu0 %v1012_v10, %s1265_s22  ;;  %vm1532_vm6 = vmpackc.low %vm1993_vm13, %vm1503_vm8  ;;  %vm2001_vm13 = vcmp.lt.s32.totalorder %v1393_v27, 15 }
  0x4e   :  { %vm2000_vm8 = vmmov %vm1996_vm10 }
  0x51   :  { %1058 = vrot.lane.b32.xlu1 %v1017_v11, %s1266_s23  ;;  %1053 = vrot.lane.b32.xlu0 %v1012_v10, %s1266_s23 }
  0x55   :  { %1068 = vrot.lane.b32.xlu1 %v1017_v11, %s1268_s24  ;;  %1063 = vrot.lane.b32.xlu0 %v1012_v10, %s1268_s24 }
  0x59   :  { %1078 = vrot.lane.b32.xlu1 %v1017_v11, %s1269_s25  ;;  %1073 = vrot.lane.b32.xlu0 %v1012_v10, %s1269_s25  ;;  %v1988_v10 = vmov 0 }
  0xaf   :  { %v1014_v31 = vpop.permute.xlu1 %1013  ;;  %v1004_v32 = vpop.permute.xlu0 %1003 }
  0xb0   :  { %v1016_v34 = vunpack.i.h.bf16 %v1014_v31  ;;  %v1015_v35 = vunpack.i.l.bf16 %v1014_v31  ;;  %v1006_v36 = vunpack.i.h.bf16 %v1004_v32  ;;  %v1005_v37 = vunpack.i.l.bf16 %v1004_v32 }
  0xb2   :  { %v125_v39 = vsel %vm1955_vm7, %v1005_v37, %v1006_v36  ;;  %v150_v40 = vsel %vm1954_vm11, %v1015_v35, %v1016_v34 }
  0xb3   :  { %v1019_v41 = vpop.permute.xlu1 %1018  ;;  %v1009_v42 = vpop.permute.xlu0 %1008  ;;  %v867_v43 = vpack.c.bf16 %v150_v40, %v125_v39 }
  0xb4   :  { %v1021_v44 = vunpack.i.h.bf16 %v1019_v41  ;;  %v1020_v45 = vunpack.i.l.bf16 %v1019_v41  ;;  %v1011_v46 = vunpack.i.h.bf16 %v1009_v42  ;;  %v1010_v47 = vunpack.i.l.bf16 %v1009_v42 }
  0xb5   :  { %869 = vmatprep.subr.msk.bf16.mxu0 %vm1428_vm15, %v867_v43 }
  0xb6   :  { %v126_v50 = vsel %vm1955_vm7, %v1011_v46, %v1005_v37  ;;  %v151_v51 = vsel %vm1954_vm11, %v1021_v44, %v1015_v35  ;;  %v123_v52 = vsel %vm1955_vm7, %v1010_v47, %v1011_v46  ;;  %v148_v53 = vsel %vm1954_vm11, %v1020_v45, %v1021_v44 }
  0xb7   :  { %v1029_v55 = vpop.permute.xlu1 %1028  ;;  %v1024_v56 = vpop.permute.xlu0 %1023  ;;  %v870_v57 = vpack.c.bf16 %v151_v51, %v126_v50  ;;  %v897_v58 = vpack.c.bf16 %v148_v53, %v123_v52  ;;  %v124_v59 = vsel %vm1955_vm7, %v1006_v36, %v1010_v47  ;;  %v149_v60 = vsel %vm1954_vm11, %v1016_v34, %v1020_v45 }
  0xb8   :  { %v1031_v61 = vunpack.i.h.bf16 %v1029_v55  ;;  %v1030_v63 = vunpack.i.l.bf16 %v1029_v55  ;;  %v1026_v5 = vunpack.i.h.bf16 %v1024_v56  ;;  %v1025_v7 = vunpack.i.l.bf16 %v1024_v56 }
  0xb9   :  { %872 = vmatpush1.bf16.msk.msra.mxu0 %vm1418_vm12, %v870_v57  ;;  %899 = vmatprep.subr.msk.bf16.mxu1 %vm1451_vm9, %v897_v58  ;;  %v900_v8 = vpack.c.bf16 %v149_v60, %v124_v59  ;;  %vm1987_vm11 = vcmp.ge.s32.totalorder %v1393_v27, 1 }
  0xba   :  { %vm1510_vm7 = vmpackc.low %vm1987_vm11, %vm86_vm5  ;;  %v173_v25 = vsel %vm1960_vm1, %v1030_v63, %v1031_v61  ;;  %v174_v30 = vsel %vm1960_vm1, %v1026_v5, %v1030_v63  ;;  %v175_v31 = vsel %vm1960_vm1, %v1025_v7, %v1026_v5  ;;  %v176_v32 = vsel %vm1960_vm1, %v1031_v61, %v1025_v7 }
  0xbb   :  { %v1989_v10 = vsel %vm1510_vm7, 4294967295, %v1988_v10  ;;  %902 = vmatpush1.bf16.msk.msra.mxu1 %vm1459_vm14, %v900_v8  ;;  %v1039_v11 = vpop.permute.xlu1 %1038  ;;  %v1034_v13 = vpop.permute.xlu0 %1033  ;;  %vm1547_vm5 = vmpackc.low %vm1997_vm2, %vm1996_vm10  ;;  %vm2005_vm2 = vcmp.lt.s32.totalorder %v1381_v21, 15 }
  0xbc   :  { %v1041_v16 = vunpack.i.h.bf16 %v1039_v11  ;;  %v1040_v17 = vunpack.i.l.bf16 %v1039_v11  ;;  %v1036_v18 = vunpack.i.h.bf16 %v1034_v13  ;;  %v1035_v19 = vunpack.i.l.bf16 %v1034_v13  ;;  %vm1562_vm1 = vmpackc.low %vm2001_vm13, %vm2000_vm8 }
  0xbd   :  { %vm2004_vm10 = vmmov %vm2000_vm8  ;;  %vm2008_vm8 = vcmp.ge.s32.totalorder %v1385_v23, 1  ;;  %vm2009_vm13 = vcmp.lt.s32.totalorder %v1383_v22, 15  ;;  %v2025_v11 = vmov 0 }
  0xbe   :  { %v198_v35 = vsel %vm1961_vm4, %v1040_v17, %v1041_v16  ;;  %v199_v36 = vsel %vm1961_vm4, %v1036_v18, %v1040_v17  ;;  %v200_v37 = vsel %vm1961_vm4, %v1035_v19, %v1036_v18  ;;  %v201_v39 = vsel %vm1961_vm4, %v1041_v16, %v1035_v19  ;;  %vm1569_vm11 = vmpackc.low %vm2005_vm2, %vm2004_vm10 }
  0xbf   :  { %v903_v41 = vpack.c.bf16 %v198_v35, %v173_v25  ;;  %v873_v42 = vpack.c.bf16 %v200_v37, %v175_v31  ;;  %v876_v43 = vpack.c.bf16 %v201_v39, %v176_v32  ;;  %v906_v44 = vpack.c.bf16 %v199_v36, %v174_v30  ;;  %v1049_v45 = vpop.permute.xlu1 %1048  ;;  %v1044_v46 = vpop.permute.xlu0 %1043  ;;  %vm1577_vm4 = vmand %vm2009_vm13, %vm2008_vm8 }
  0xc0   :  { %v1051_v50 = vunpack.i.h.bf16 %v1049_v45  ;;  %v1050_v51 = vunpack.i.l.bf16 %v1049_v45  ;;  %v1046_v52 = vunpack.i.h.bf16 %v1044_v46  ;;  %v1045_v53 = vunpack.i.l.bf16 %v1044_v46 }
  0xc1   :  { %875 = vmatprep.subr.msk.bf16.mxu0 %vm1475_vm0, %v873_v42  ;;  %905 = vmatprep.subr.msk.bf16.mxu1 %vm1510_vm7, %v903_v41  ;;  %vm2012_vm10 = vcmp.ge.s32.totalorder %v1393_v27, 1  ;;  %vm2013_vm2 = vcmp.lt.s32.totalorder %v1391_v26, 15  ;;  %vm89_vm8 = vcmp.lt.s32.totalorder %v1395_v28, 15  ;;  %vm2016_vm13 = vcmp.lt.s32.totalorder %v1373_v14, 127 }
  0xc2   :  { %vm1589_vm14 = vmand %vm2013_vm2, %vm2012_vm10  ;;  %v223_v57 = vsel %vm2016_vm13, %v1050_v51, %v1051_v50  ;;  %878 = vmatpush1.bf16.msk.msra.mxu0 %vm1522_vm3, %v876_v43  ;;  %vm2020_vm10 = vcmask 1043456   ;;  %vm2021_vm2 = vcmp.lt.s32.totalorder %v1397_v29, 15  ;;  %908 = vmatpush1.bf16.msk.msra.mxu1 %vm1532_vm6, %v906_v44  ;;  %v2039_v25 = vmov 0 }
  0xc3   :  { %vm2017_vm0 = vmmov %vm2016_vm13  ;;  %v912_v62 = vpack.c.bf16 %v223_v57, %v1337_v3  ;;  %v1059_v8 = vpop.permute.xlu1 %1058  ;;  %v1054_v9 = vpop.permute.xlu0 %1053  ;;  %v1270_v28 = vmov 1.0  }
  0xc4   :  { %v224_v58 = vsel %vm2017_vm0, %v1046_v52, %v1050_v51  ;;  %vm2018_vm7 = vmmov %vm2017_vm0  ;;  %v1061_v3 = vunpack.i.h.bf16 %v1059_v8  ;;  %v1055_v13 = vunpack.i.l.bf16 %v1054_v9 }
  0xc5   :  { %v225_v59 = vsel %vm2018_vm7, %v1045_v53, %v1046_v52  ;;  %vm2019_vm9 = vmmov %vm2017_vm0  ;;  %v879_v63 = vpack.c.bf16 %v224_v58, %v1341_v4  ;;  %vm2024_vm7 = vcmp.lt.s32.totalorder %v1383_v22, 15  ;;  %vm2027_vm0 = vcmp.lt.s32.totalorder %v1391_v26, 15 }
  0xc6   :  { %v226_v60 = vsel %vm2019_vm9, %v1051_v50, %v1045_v53  ;;  %vm1608_vm12 = vmpackc.low %vm2021_vm2, %vm2020_vm10  ;;  %v882_v5 = vpack.c.bf16 %v225_v59, %v1334_v2  ;;  %v1060_v4 = vunpack.i.l.bf16 %v1059_v8  ;;  %vm2031_vm10 = vcmp.lt.s32.totalorder %v1379_v20, 15 }
  0xc7   :  { %v909_v7 = vpack.c.bf16 %v226_v60, %v1347_v6  ;;  %vm1622_vm9 = vmpackc.low %vm2024_vm7, %vm1577_vm4  ;;  %v1056_v6 = vunpack.i.h.bf16 %v1054_v9  ;;  %881 = vmatprep.subr.msk.bf16.mxu0 %vm1547_vm5, %v879_v63  ;;  %vm2030_vm4 = vcmp.ge.s32.totalorder %v1381_v21, 1  ;;  %vm2034_vm7 = vcmp.ge.s32.totalorder %v1397_v29, 1  ;;  %v1069_v18 = vpop.permute.xlu1 %1068  ;;  %v1064_v19 = vpop.permute.xlu0 %1063 }
  0xc8   :  { %v2026_v11 = vsel %vm1622_vm9, 4294967295, %v2025_v11  ;;  %vm1630_vm13 = vmpackc.low %vm2027_vm0, %vm1589_vm14  ;;  %vm1967_vm14 = vcmp.lt.s32.totalorder %v1373_v14, 113  ;;  %884 = vmatpush1.bf16.msk.msra.mxu0 %vm1569_vm11, %v882_v5  ;;  %vm2038_vm11 = vcmp.lt.s32.totalorder %v1383_v22, 15  ;;  %v1071_v30 = vunpack.i.h.bf16 %v1069_v18 }
  0xc9   :  { %911 = vmatprep.subr.msk.bf16.mxu1 %vm1562_vm1, %v909_v7  ;;  %vm1642_vm2 = vmand %vm2031_vm10, %vm2030_vm4  ;;  %vm2037_vm4 = vcmp.lt.s32.totalorder %v1385_v23, 15  ;;  %v1070_v31 = vunpack.i.l.bf16 %v1069_v18  ;;  %v1066_v32 = vunpack.i.h.bf16 %v1064_v19  ;;  %v1065_v34 = vunpack.i.l.bf16 %v1064_v19 }
  0xca   :  { %vm1653_vm5 = vmand %vm89_vm8, %vm2034_vm7  ;;  %914 = vmatpush1.bf16.msk.msra.mxu1 %vm1608_vm12, %v912_v62  ;;  %vm1968_vm7 = vcmask 1040384   ;;  %vm2041_vm12 = vcmp.lt.s32.totalorder %v1379_v20, 15  ;;  %v248_v22 = vsel %vm1967_vm14, %v1060_v4, %v1061_v3  ;;  %v249_v36 = vsel %vm1967_vm14, %v1056_v6, %v1060_v4 }
  0xcb   :  { %vm1665_vm10 = vmand %vm2038_vm11, %vm2037_vm4  ;;  %v250_v37 = vsel %vm1967_vm14, %v1055_v13, %v1056_v6  ;;  %v251_v39 = vsel %vm1967_vm14, %v1061_v3, %v1055_v13  ;;  %vm2046_vm4 = vcmp.lt.s32.totalorder %v1373_v14, 112  ;;  %v1079_v52 = vpop.permute.xlu1 %1078  ;;  %v1074_v53 = vpop.permute.xlu0 %1073  ;;  %v314_v3 = vld [vmem:[#allocation5] sm:$0xff] }
  0xcc   :  { %v2040_v25 = vsel %vm1665_vm10, 4294967295, %v2039_v25  ;;  %vm1673_vm1 = vmpackc.low %vm2041_vm12, %vm1642_vm2  ;;  %v273_v41 = vsel %vm2046_vm4, %v1070_v31, %v1071_v30  ;;  %v1081_v56 = vunpack.i.h.bf16 %v1079_v52  ;;  %v1080_v57 = vunpack.i.l.bf16 %v1079_v52 }
  0xcd   :  { %vm1689_vm2 = vmpackc.low %vm89_vm8, %vm1653_vm5  ;;  %v918_v46 = vpack.c.bf16 %v273_v41, %v248_v22  ;;  %vm2052_vm5 = vcmp.lt.s32.totalorder %v1393_v27, 15  ;;  %v1076_v58 = vunpack.i.h.bf16 %v1074_v53  ;;  %v1075_v59 = vunpack.i.l.bf16 %v1074_v53 }
  0xce   :  { %vm2047_vm11 = vmmov %vm2046_vm4 }
  0xcf   :  { %v274_v42 = vsel %vm2047_vm11, %v1066_v32, %v1070_v31  ;;  %vm2048_vm12 = vmmov %vm2046_vm4 }
  0xd0   :  { %v275_v43 = vsel %vm2048_vm12, %v1065_v34, %v1066_v32  ;;  %vm2049_vm0 = vmmov %vm2046_vm4  ;;  %v885_v47 = vpack.c.bf16 %v274_v42, %v249_v36  ;;  %vm2053_vm4 = vcmp.lt.s32.totalorder %v1391_v26, 15  ;;  %vm2057_vm12 = vcmp.lt.s32.totalorder %v1379_v20, 15 }
  0xd1   :  { %v276_v44 = vsel %vm2049_vm0, %v1071_v30, %v1065_v34  ;;  %vm1704_vm14 = vmpackc.low %vm1968_vm7, %vm1665_vm10  ;;  %v888_v50 = vpack.c.bf16 %v275_v43, %v250_v37  ;;  %vm2056_vm0 = vcmp.lt.s32.totalorder %v1381_v21, 15  ;;  %vm2063_vm10 = vcmp.lt.s32.totalorder %v1373_v14, 111 }
  0xd2   :  { %v915_v51 = vpack.c.bf16 %v276_v44, %v251_v39  ;;  %vm1712_vm11 = vmand %vm2053_vm4, %vm2052_vm5  ;;  %887 = vmatprep.subr.msk.bf16.mxu0 %vm1622_vm9, %v885_v47  ;;  %vm2060_vm5 = vcmp.lt.s32.totalorder %v1397_v29, 15  ;;  %v298_v20 = vsel %vm2063_vm10, %v1080_v57, %v1081_v56 }
  0xd3   :  { %vm1720_vm7 = vmand %vm2057_vm12, %vm2056_vm0  ;;  %890 = vmatpush1.bf16.msk.msra.mxu0 %vm1673_vm1, %v888_v50  ;;  %v924_v5 = vpack.c.bf16 %v1270_v28, %v298_v20 }
  0xd4   :  { %917 = vmatprep.subr.msk.bf16.mxu1 %vm1630_vm13, %v915_v51  ;;  %vm1732_vm4 = vmand %vm89_vm8, %vm2060_vm5  ;;  %vm2067_vm8 = vcmask 1040384  }
  0xd5   :  { %vm2064_vm0 = vmmov %vm2063_vm10  ;;  %920 = vmatpush1.bf16.msk.msra.mxu1 %vm1689_vm2, %v918_v46 }
  0xd6   :  { %v299_v61 = vsel %vm2064_vm0, %v1076_v58, %v1080_v57  ;;  %vm2065_vm12 = vmmov %vm2064_vm0 }
  0xd7   :  { %v300_v62 = vsel %vm2065_vm12, %v1075_v59, %v1076_v58  ;;  %vm2066_vm9 = vmmov %vm2064_vm0  ;;  %v891_v7 = vpack.c.bf16 %v1270_v28, %v299_v61 }
  0xd8   :  { %v301_v63 = vsel %vm2066_vm9, %v1081_v56, %v1075_v59  ;;  %vm922_vm5 = vmpackc.low %vm2067_vm8, %vm1712_vm11  ;;  %v894_v8 = vpack.c.bf16 %v1270_v28, %v300_v62 }
  0xd9   :  { %v921_v9 = vpack.c.bf16 %v1270_v28, %v301_v63  ;;  %vm2068_vm10 = vmmov %vm2067_vm8  ;;  %893 = vmatprep.subr.msk.bf16.mxu0 %vm1704_vm14, %v891_v7  ;;  %vm2070_vm14 = vcmp.lt.s32.totalorder %v1373_v14, 17 }
  0xda   :  { %vm895_vm0 = vmpackc.low %vm2068_vm10, %vm1720_vm7 }
  0xdb   :  { %vm2069_vm9 = vmmov %vm2067_vm8  ;;  %923 = vmatprep.subr.msk.bf16.mxu1 %vm922_vm5, %v921_v9  ;;  %896 = vmatpush1.bf16.msk.msra.mxu0 %vm895_vm0, %v894_v8  ;;  %vm315_vm8 = vcmask 596992  }
  0xdc   :  { %vm925_vm12 = vmpackc.low %vm2069_vm9, %vm1732_vm4  ;;  %vm2074_vm9 = vcmp.lt.s32.totalorder %v1373_v14, 16 }
  0xdd   :  { %926 = vmatpush1.bf16.msk.msra.mxu1 %vm925_vm12, %v924_v5  ;;  %vm2071_vm5 = vmmov %vm2070_vm14 }
  0xde   :  { %807 = vmatmul.mubr.msk.f32.vlgmr.msra.gmra.mrb[0].mxu0 %vm315_vm8, %v314_v3  ;;  %vm2072_vm10 = vmmov %vm2071_vm5 }
  0xdf   :  { %689 = vmatprep.mubr.f32.mxu0 %v1267_v12  ;;  %vm2073_vm0 = vmmov %vm2071_vm5 }
  0xe0   :  { %828 = vmatmul.mubr.msk.f32.vlgmr.msra.gmra.mrb[0].mxu1 %vm315_vm8, %v314_v3  ;;  %vm2075_vm12 = vmmov %vm2074_vm9 }
  0xe1   :  { %760 = vmatprep.mubr.f32.mxu1 %v1267_v12  ;;  %vm2076_vm8 = vmmov %vm2074_vm9 }
 0x1b1   :  { %v1761_v4 = vpop.f32.mrb[0].mxu0 }
 0x1b2   :  { %v465_v6 = vmax.f32 %v1761_v4, 0.0  ;;  %v1766_v16 = vpop.f32.mrb[1].mxu0 }
 0x1b3   :  { %v1764_v13 = vpop.f32.mrb[0].mxu1  ;;  %v466_v18 = vmax.f32 %v1766_v16, 0.0 }
 0x1b4   :  { %v467_v17 = vmax.f32 %v1764_v13, 0.0  ;;  %v1770_v19 = vpop.f32.mrb[1].mxu1  ;;  %v599_v13 = vcombine.high %v1329_v0, %v1329_v0 }
 0x1b5   :  { %v468_v30 = vmax.f32 %v1770_v19, 0.0  ;;  %v1082_v12 = vpack.i.bf16 %v466_v18, %v465_v6  ;;  %v600_v19 = vcombine.high %v1331_v1, %v1331_v1 }
 0x1b7   :  { %v1087_v31 = vpack.i.bf16 %v468_v30, %v467_v17  ;;  %1083 = vrot.lane.b32.xlu0 %v1082_v12, %s1262_s19 }
 0x1b9   :  { %1088 = vrot.lane.b32.xlu1 %v1087_v31, %s1262_s19 }
 0x1bb   :  { %1093 = vrot.lane.b32.xlu0 %v1082_v12, %s1261_s2 }
 0x1bd   :  { %1098 = vrot.lane.b32.xlu1 %v1087_v31, %s1261_s2 }
 0x1bf   :  { %1103 = vrot.lane.b32.xlu0 %v1082_v12, %s1263_s20 }
 0x1c1   :  { %1108 = vrot.lane.b32.xlu1 %v1087_v31, %s1263_s20 }
 0x1c3   :  { %1113 = vrot.lane.b32.xlu0 %v1082_v12, %s1264_s21 }
 0x1c5   :  { %1118 = vrot.lane.b32.xlu1 %v1087_v31, %s1264_s21 }
 0x1c7   :  { %1123 = vrot.lane.b32.xlu0 %v1082_v12, %s1265_s22 }
 0x1c9   :  { %1128 = vrot.lane.b32.xlu1 %v1087_v31, %s1265_s22 }
 0x1cb   :  { %1133 = vrot.lane.b32.xlu0 %v1082_v12, %s1266_s23 }
 0x1cd   :  { %1138 = vrot.lane.b32.xlu1 %v1087_v31, %s1266_s23 }
 0x1cf   :  { %1143 = vrot.lane.b32.xlu0 %v1082_v12, %s1268_s24 }
 0x1d1   :  { %1148 = vrot.lane.b32.xlu1 %v1087_v31, %s1268_s24 }
 0x1d3   :  { %1153 = vrot.lane.b32.xlu0 %v1082_v12, %s1269_s25 }
 0x1d5   :  { %1158 = vrot.lane.b32.xlu1 %v1087_v31, %s1269_s25 }
 0x229   :  { %v1084_v32 = vpop.permute.xlu0 %1083 }
 0x22a   :  { %v1086_v22 = vunpack.i.h.bf16 %v1084_v32  ;;  %v1085_v36 = vunpack.i.l.bf16 %v1084_v32 }
 0x22b   :  { %v1089_v34 = vpop.permute.xlu1 %1088 }
 0x22c   :  { %v1091_v37 = vunpack.i.h.bf16 %v1089_v34  ;;  %v1090_v39 = vunpack.i.l.bf16 %v1089_v34  ;;  %v479_v45 = vsel %vm2070_vm14, %v1085_v36, %v1086_v22  ;;  %vm2077_vm14 = vmmov %vm2076_vm8 }
 0x22d   :  { %v1094_v41 = vpop.permute.xlu0 %1093 }
 0x22e   :  { %v1096_v43 = vunpack.i.h.bf16 %v1094_v41  ;;  %v1095_v44 = vunpack.i.l.bf16 %v1094_v41  ;;  %v477_v50 = vsel %vm2071_vm5, %v1090_v39, %v1091_v37  ;;  %v478_v51 = vsel %vm2072_vm10, %v1086_v22, %v1090_v39 }
 0x22f   :  { %v1099_v42 = vpop.permute.xlu1 %1098  ;;  %v480_v52 = vsel %vm2073_vm0, %v1091_v37, %v1085_v36  ;;  %vm2078_vm5 = vnez %v1978_v48  ;;  %vm2079_vm10 = vnez %v1974_v33  ;;  %vm2080_vm0 = vnez %v1980_v49 }
 0x230   :  { %v1101_v46 = vunpack.i.h.bf16 %v1099_v42  ;;  %v1100_v47 = vunpack.i.l.bf16 %v1099_v42  ;;  %v495_v53 = vsel %vm2074_vm9, %v1095_v44, %v1096_v43  ;;  %vm2081_vm9 = vcmp.lt.s32.totalorder %v1373_v14, 15 }
 0x231   :  { %v927_v59 = vpack.c.bf16 %v495_v53, %v479_v45  ;;  %v1104_v20 = vpop.permute.xlu0 %1103 }
 0x232   :  { %v493_v56 = vsel %vm2075_vm12, %v1100_v47, %v1101_v46  ;;  %v494_v57 = vsel %vm2076_vm8, %v1096_v43, %v1100_v47  ;;  %v496_v58 = vsel %vm2077_vm14, %v1101_v46, %v1095_v44  ;;  %v1106_v8 = vunpack.i.h.bf16 %v1104_v20  ;;  %vm2083_vm12 = vmmov %vm2081_vm9 }
 0x233   :  { %v957_v61 = vpack.c.bf16 %v493_v56, %v477_v50  ;;  %v930_v62 = vpack.c.bf16 %v496_v58, %v480_v52  ;;  %v960_v63 = vpack.c.bf16 %v494_v57, %v478_v51  ;;  %v1109_v28 = vpop.permute.xlu1 %1108  ;;  %929 = vmatprep.subr.msk.bf16.mxu0 %vm1428_vm15, %v927_v59  ;;  %v1105_v9 = vunpack.i.l.bf16 %v1104_v20  ;;  %vm2082_vm15 = vmmov %vm2081_vm9 }
 0x234   :  { %v1111_v5 = vunpack.i.h.bf16 %v1109_v28  ;;  %v1110_v7 = vunpack.i.l.bf16 %v1109_v28  ;;  %vm2084_vm8 = vmmov %vm2081_vm9  ;;  %vm2085_vm14 = vcmp.lt.s32.totalorder %v1373_v14, 1 }
 0x235   :  { %959 = vmatprep.subr.msk.bf16.mxu1 %vm2078_vm5, %v957_v61  ;;  %932 = vmatpush1.bf16.msk.msra.mxu0 %vm2079_vm10, %v930_v62  ;;  %v1114_v3 = vpop.permute.xlu0 %1113  ;;  %v511_v48 = vsel %vm2083_vm12, %v1105_v9, %v1106_v8  ;;  %vm2086_vm5 = vmmov %vm2085_vm14  ;;  %vm1271_vm12 = vmmov 1  }
 0x236   :  { %962 = vmatpush1.bf16.msk.msra.mxu1 %vm2080_vm0, %v960_v63  ;;  %v1116_v31 = vunpack.i.h.bf16 %v1114_v3  ;;  %v1115_v32 = vunpack.i.l.bf16 %v1114_v3  ;;  %v509_v34 = vsel %vm2081_vm9, %v1110_v7, %v1111_v5  ;;  %v510_v36 = vsel %vm2082_vm15, %v1106_v8, %v1110_v7  ;;  %vm2087_vm10 = vmmov %vm2086_vm5 }
 0x237   :  { %v1119_v12 = vpop.permute.xlu1 %1118  ;;  %v512_v33 = vsel %vm2084_vm8, %v1111_v5, %v1105_v9  ;;  %vm2088_vm0 = vmmov %vm2086_vm5  ;;  %vm2089_vm9 = vnez %v1982_v54  ;;  %vm2090_vm15 = vnez %v1989_v10  ;;  %vm2091_vm8 = vcmp.lt.s32.totalorder %v1385_v23, 15 }
 0x238   :  { %v1121_v38 = vunpack.i.h.bf16 %v1119_v12  ;;  %v1120_v22 = vunpack.i.l.bf16 %v1119_v12  ;;  %v527_v49 = vsel %vm2085_vm14, %v1115_v32, %v1116_v31  ;;  %vm1846_vm14 = vmpackc.low %vm2091_vm8, %vm1271_vm12 }
 0x239   :  { %v933_v42 = vpack.c.bf16 %v527_v49, %v511_v48  ;;  %v1124_v43 = vpop.permute.xlu0 %1123 }
 0x23a   :  { %v525_v37 = vsel %vm2086_vm5, %v1120_v22, %v1121_v38  ;;  %v526_v39 = vsel %vm2087_vm10, %v1116_v31, %v1120_v22  ;;  %v528_v41 = vsel %vm2088_vm0, %v1121_v38, %v1115_v32  ;;  %v1126_v50 = vunpack.i.h.bf16 %v1124_v43 }
 0x23b   :  { %v963_v44 = vpack.c.bf16 %v525_v37, %v509_v34  ;;  %v936_v45 = vpack.c.bf16 %v528_v41, %v512_v33  ;;  %v966_v46 = vpack.c.bf16 %v526_v39, %v510_v36  ;;  %v1129_v47 = vpop.permute.xlu1 %1128  ;;  %v1125_v53 = vunpack.i.l.bf16 %v1124_v43  ;;  %935 = vmatprep.subr.msk.bf16.mxu0 %vm2089_vm9, %v933_v42 }
 0x23c   :  { %v1131_v51 = vunpack.i.h.bf16 %v1129_v47  ;;  %v1130_v52 = vunpack.i.l.bf16 %v1129_v47  ;;  %vm2094_vm5 = vcmp.lt.s32.totalorder %v1373_v14, 127 }
 0x23d   :  { %965 = vmatprep.subr.msk.bf16.mxu1 %vm2090_vm15, %v963_v44  ;;  %938 = vmatpush1.bf16.msk.msra.mxu0 %vm1522_vm3, %v936_v45  ;;  %vm2095_vm10 = vmmov %vm2094_vm5  ;;  %v1134_v23 = vpop.permute.xlu0 %1133  ;;  %vm2098_vm3 = vcmp.lt.s32.totalorder %v1393_v27, 15 }
 0x23e   :  { %v541_v57 = vsel %vm2094_vm5, %v1130_v52, %v1131_v51  ;;  %v542_v54 = vsel %vm2095_vm10, %v1126_v50, %v1130_v52  ;;  %vm2096_vm0 = vmmov %vm2094_vm5  ;;  %968 = vmatpush1.bf16.msk.msra.mxu1 %vm1532_vm6, %v966_v46  ;;  %vm2099_vm6 = vcmp.lt.s32.totalorder %v1381_v21, 15  ;;  %vm2100_vm5 = vcmp.lt.s32.totalorder %v1397_v29, 15 }
 0x23f   :  { %v543_v10 = vsel %vm2096_vm0, %v1125_v53, %v1126_v50  ;;  %vm2097_vm9 = vmmov %vm2096_vm0  ;;  %v972_v58 = vpack.c.bf16 %v541_v57, %v467_v17  ;;  %v939_v59 = vpack.c.bf16 %v542_v54, %v466_v18  ;;  %v1139_v62 = vpop.permute.xlu1 %1138  ;;  %v1136_v16 = vunpack.i.h.bf16 %v1134_v23 }
 0x240   :  { %v544_v15 = vsel %vm2097_vm9, %v1131_v51, %v1125_v53  ;;  %vm970_vm15 = vmpackc.low %vm2098_vm3, %vm1271_vm12  ;;  %v942_v20 = vpack.c.bf16 %v543_v10, %v465_v6  ;;  %v1141_v24 = vunpack.i.h.bf16 %v1139_v62  ;;  %v1140_v27 = vunpack.i.l.bf16 %v1139_v62 }
 0x241   :  { %v969_v61 = vpack.c.bf16 %v544_v15, %v468_v30  ;;  %vm943_vm8 = vmpackc.low %vm2099_vm6, %vm1271_vm12  ;;  %v1135_v4 = vunpack.i.l.bf16 %v1134_v23  ;;  %941 = vmatprep.subr.msk.bf16.mxu0 %vm1846_vm14, %v939_v59  ;;  %vm612_vm0 = vcmask 1044480   ;;  %v1144_v6 = vpop.permute.xlu0 %1143  ;;  %vm2101_vm9 = vcmask 1043456  }
 0x242   :  { %vm973_vm10 = vmpackc.low %vm2100_vm5, %vm1271_vm12  ;;  %944 = vmatpush1.bf16.msk.msra.mxu0 %vm943_vm8, %v942_v20  ;;  %v605_v21 = vsel %vm2101_vm9, %v1331_v1, 1.0  ;;  %v1146_v18 = vunpack.i.h.bf16 %v1144_v6  ;;  %v1145_v29 = vunpack.i.l.bf16 %v1144_v6  ;;  %vm2103_vm3 = vcmp.lt.s32.totalorder %v1373_v14, 113 }
 0x243   :  { %971 = vmatprep.subr.msk.bf16.mxu1 %vm970_vm15, %v969_v61  ;;  %v1149_v17 = vpop.permute.xlu1 %1148  ;;  %vm2102_vm12 = vmmov %vm2101_vm9  ;;  %v557_v63 = vsel %vm2103_vm3, %v1140_v27, %v1141_v24  ;;  %vm2108_vm5 = vcmp.lt.s32.totalorder %v1373_v14, 112 }
 0x244   :  { %974 = vmatpush1.bf16.msk.msra.mxu1 %vm973_vm10, %v972_v58  ;;  %v603_v30 = vsel %vm2102_vm12, %v1329_v0, 1.0  ;;  %v1151_v28 = vunpack.i.h.bf16 %v1149_v17  ;;  %v1150_v5 = vunpack.i.l.bf16 %v1149_v17  ;;  %vm2104_vm14 = vmmov %vm2101_vm9  ;;  %v575_v1 = vsel %vm2108_vm5, %v1145_v29, %v1146_v18 }
 0x245   :  { %v604_v7 = vsel %vm2104_vm14, %v599_v13, 1.0  ;;  %vm2105_vm15 = vmmov %vm2103_vm3  ;;  %v1154_v34 = vpop.permute.xlu0 %1153 }
 0x246   :  { %v558_v8 = vsel %vm2105_vm15, %v1136_v16, %v1140_v27  ;;  %vm2106_vm6 = vmmov %vm2103_vm3  ;;  %v1156_v33 = vunpack.i.h.bf16 %v1154_v34  ;;  %v1155_v41 = vunpack.i.l.bf16 %v1154_v34  ;;  %vm2114_vm15 = vnez %v2040_v25 }
 0x247   :  { %v559_v9 = vsel %vm2106_vm6, %v1135_v4, %v1136_v16  ;;  %vm2107_vm8 = vmmov %vm2103_vm3  ;;  %v1159_v48 = vpop.permute.xlu1 %1158 }
 0x248   :  { %v560_v3 = vsel %vm2107_vm8, %v1141_v24, %v1135_v4  ;;  %vm2109_vm10 = vmmov %vm2108_vm5  ;;  %v948_v32 = vpack.c.bf16 %v575_v1, %v559_v9  ;;  %v1161_v49 = vunpack.i.h.bf16 %v1159_v48  ;;  %v1160_v37 = vunpack.i.l.bf16 %v1159_v48 }
 0x249   :  { %v573_v0 = vsel %vm2109_vm10, %v1150_v5, %v1151_v28  ;;  %vm2110_vm9 = vmmov %vm2108_vm5  ;;  %vm2115_vm8 = vcmp.lt.s32.totalorder %v1373_v14, 111  ;;  %v607_v14 = vld [vmem:[#allocation7] sm:$0xff] }
 0x24a   :  { %v574_v12 = vsel %vm2110_vm9, %v1146_v18, %v1150_v5  ;;  %vm2111_vm12 = vmmov %vm2108_vm5  ;;  %v978_v38 = vpack.c.bf16 %v573_v0, %v557_v63  ;;  %v589_v42 = vsel %vm2115_vm8, %v1160_v37, %v1161_v49 }
 0x24b   :  { %v576_v31 = vsel %vm2111_vm12, %v1151_v28, %v1145_v29  ;;  %v945_v22 = vpack.c.bf16 %v574_v12, %v558_v8  ;;  %vm2112_vm3 = vmmov %vm2104_vm14  ;;  %vm2113_vm14 = vnez %v2026_v11  ;;  %v984_v2 = vpack.c.bf16 %v605_v21, %v589_v42 }
 0x24c   :  { %v975_v36 = vpack.c.bf16 %v576_v31, %v560_v3  ;;  %v606_v39 = vsel %vm2112_vm3, %v600_v19, 1.0  ;;  %vm952_vm6 = vmpackc.low %vm612_vm0, %vm2114_vm15 }
 0x24d   :  { %947 = vmatprep.subr.msk.bf16.mxu0 %vm2113_vm14, %v945_v22  ;;  %vm2116_vm5 = vmmov %vm2115_vm8 }
 0x24e   :  { %977 = vmatprep.subr.msk.bf16.mxu1 %vm1630_vm13, %v975_v36  ;;  %v590_v43 = vsel %vm2116_vm5, %v1156_v33, %v1160_v37  ;;  %vm2117_vm10 = vmmov %vm2116_vm5  ;;  %950 = vmatpush1.bf16.msk.msra.mxu0 %vm1673_vm1, %v948_v32  ;;  %vm608_vm1 = vcmask 629760  }
 0x24f   :  { %v591_v44 = vsel %vm2117_vm10, %v1155_v41, %v1156_v33  ;;  %vm2118_vm9 = vmmov %vm2116_vm5  ;;  %v951_v25 = vpack.c.bf16 %v604_v7, %v590_v43  ;;  %980 = vmatpush1.bf16.msk.msra.mxu1 %vm1689_vm2, %v978_v38 }
 0x250   :  { %v592_v11 = vsel %vm2118_vm9, %v1161_v49, %v1155_v41  ;;  %vm982_vm13 = vmpackc.low %vm612_vm0, %vm1712_vm11  ;;  %v954_v45 = vpack.c.bf16 %v603_v30, %v591_v44 }
 0x251   :  { %vm955_vm12 = vmpackc.low %vm612_vm0, %vm1720_vm7  ;;  %v981_v46 = vpack.c.bf16 %v606_v39, %v592_v11  ;;  %953 = vmatprep.subr.msk.bf16.mxu0 %vm952_vm6, %v951_v25 }
 0x252   :  { %vm985_vm3 = vmpackc.low %vm612_vm0, %vm1732_vm4  ;;  %956 = vmatpush1.bf16.msk.msra.mxu0 %vm955_vm12, %v954_v45 }
 0x253   :  { %983 = vmatprep.subr.msk.bf16.mxu1 %vm982_vm13, %v981_v46 }
 0x254   :  { %986 = vmatpush1.bf16.msk.msra.mxu1 %vm985_vm3, %v984_v2 }
 0x255   :  { %847 = vmatmul.mubr.msk.f32.vlgmr.msra.gmra.mrb[2].mxu0 %vm608_vm1, %v607_v14 }
 0x257   :  { %866 = vmatmul.mubr.msk.f32.vlgmr.msra.gmra.mrb[2].mxu1 %vm608_vm1, %v607_v14 }
 0x328   :  { %v691_v35 = vpop.f32.mrb[2].mxu0 }
 0x329   :  { %767 = vst [vmem:[#allocation8] sm:$0xff] %v691_v35  ;;  %v693_v60 = vpop.f32.mrb[3].mxu0 }
 0x32a   :  { %v762_v55 = vpop.f32.mrb[2].mxu1  ;;  %768 = vst [vmem:[#allocation8 + $0x8] sm:$0xff] %v693_v60 }
 0x32b   :  { %769 = vst [vmem:[#allocation8 + $0x10] sm:$0xff] %v762_v55  ;;  %v764_v40 = vpop.f32.mrb[3].mxu1 }
 0x32c   :  { %770 = vst [vmem:[#allocation8 + $0x18] sm:$0xff] %v764_v40 }
 0x32d   :  { %1241 = shalt.err (!%p1238_p0)
}
 0x32e   :  { %s1242_s4 = scalar_lea.hbm %s1948_s3, 512 }
 0x32f   :  { %p1243_p1 = scmp.ne.s32.totalorder %s1948_s3, %s1242_s4  ;;  %p1246_p2 = scmp.lt.u32.totalorder %s1242_s4, %s1948_s3 }
 0x331   :  { %p1248_p3 = pnand %p1246_p2, %p1243_p1 }
 0x333   :  { %1251 = shalt.err (!%p1248_p3)
}
 0x334   :  { %780 = dma.vmem_to_hbm [thread:$0]  %s778_s27, 512, %s1948_s3, [#allocation4]  }
 0x335   :  { %1256 = dma.done.wait [#allocation4], 512  }
 0x336   :  { %1257 = vsyncadd [#allocation4], 4294966784 }
 0x337   :  { %784 = vsyncpa [#allocation3], 1 }
 0x338   :  { %785 = vsyncpa [#allocation6], 1 }
 0x339   :  { %786 = vsyncpa [#allocation4], 1 }

</bundles_post_ra>
